<compile_context>
chip_gen: v6e
topology: v6e:2x2x1
jax: 0.10.0
libtpu: 0.0.40
codegen_flags: <defaults>
</compile_context>

<pallas_src>
import functools

import jax
import jax.numpy as jnp
from jax.experimental import pallas as pl
from jax.experimental.pallas import tpu as pltpu


_SQRT_2_OVER_PI = 0.7978845608028654  # sqrt(2/pi), precomputed Python float


def _gelu_tanh(x):
    # GPT-2 tanh GELU. Horner form: x + 0.044715*x^3 == x * (1 + 0.044715*x*x)
    inner = x * (1.0 + 0.044715 * (x * x))
    return 0.5 * x * (1.0 + jnp.tanh(_SQRT_2_OVER_PI * inner))


def _round_up(n, m):
    return ((n + m - 1) // m) * m


def _hw_config():
    """Generation-specific tiling defaults (trace-time / host-side query)."""
    try:
        kind = jax.devices()[0].device_kind.lower()
    except Exception:  # pragma: no cover - defensive
        kind = ""
    if "v7" in kind:
        # 64 MiB VMEM, 2 TensorCores/chip, ~310 FLOP/byte roofline.
        return dict(tm=384, th=256, vmem=54 * 1024 * 1024, lane=256, cores=2)
    if "v6" in kind:
        # 128 MiB VMEM, ~650-700 FLOP/byte roofline -> big token tile.
        return dict(tm=768, th=512, vmem=100 * 1024 * 1024, lane=256, cores=1)
    if "v5" in kind:
        # 128 MiB VMEM, ~240 FLOP/byte (bf16) roofline.
        return dict(tm=512, th=512, vmem=100 * 1024 * 1024, lane=128, cores=1)
    # Unknown hardware: conservative tiles + default-ish scoped VMEM.
    return dict(tm=256, th=256, vmem=48 * 1024 * 1024, lane=128, cores=1)


def _sublane_pack(dtype):
    itemsize = jnp.dtype(dtype).itemsize
    if itemsize >= 4:
        return 8
    if itemsize == 2:
        return 16
    return 32


def _pick_hidden_tile(Hp, th_request):
    """Largest multiple of 128 that divides Hp and is <= th_request."""
    th_request = max(128, th_request)
    units = Hp // 128
    best = 128
    for d in range(1, units + 1):
        if units % d == 0 and 128 * d <= th_request:
            best = 128 * d
    return best


def _fit_token_tile(tm, th, Dp, x_bytes, w_bytes, out_bytes, use_acc, limit, pack):
    """Shrink the token tile until the double-buffered tile set fits VMEM."""
    def need(t):
        n = 2 * t * Dp * x_bytes          # x tile, double-buffered
        n += 2 * t * Dp * out_bytes       # output tile (conservative 2x)
        if use_acc:
            n += t * Dp * 4               # f32 accumulator scratch
        n += 2 * Dp * th * w_bytes        # W1 tile, double-buffered
        n += 2 * th * Dp * w_bytes        # W2 tile, double-buffered
        return n

    while tm > pack and need(tm) > int(limit * 0.9):
        tm = max(pack, _round_up(tm // 2, pack))
    return tm


# ---------------------------------------------------------------------------
# Kernels. Grid = (token tiles, hidden tiles); hidden axis is a reduction
# (output block resident across it).
# ---------------------------------------------------------------------------

def _expert_gelu_kernel_acc(x_ref, w1_ref, b1_ref, w2_ref, b2_ref, o_ref, acc_ref):
    """Non-f32 output: accumulate in an f32 VMEM scratch, cast on finalize."""
    k = pl.program_id(1)

    @pl.when(k == 0)
    def _init():
        acc_ref[...] = jnp.zeros_like(acc_ref)

    h = jnp.dot(x_ref[...], w1_ref[...], preferred_element_type=jnp.float32)
    h = h + b1_ref[...].astype(jnp.float32)
    g = _gelu_tanh(h)
    acc_ref[...] += jnp.dot(g.astype(w2_ref.dtype), w2_ref[...],
                            preferred_element_type=jnp.float32)

    @pl.when(k == pl.num_programs(1) - 1)
    def _finalize():
        o_ref[...] = (acc_ref[...] + b2_ref[...].astype(jnp.float32)
                      ).astype(o_ref.dtype)


def _expert_gelu_kernel_f32(x_ref, w1_ref, b1_ref, w2_ref, b2_ref, o_ref):
    """f32 output: accumulate directly into the resident output block."""
    k = pl.program_id(1)

    h = jnp.dot(x_ref[...], w1_ref[...], preferred_element_type=jnp.float32)
    h = h + b1_ref[...].astype(jnp.float32)
    g = _gelu_tanh(h)
    p_sum = jnp.dot(g.astype(w2_ref.dtype), w2_ref[...],
                    preferred_element_type=jnp.float32)

    @pl.when(k == 0)
    def _first():
        o_ref[...] = p_sum + b2_ref[...].astype(jnp.float32)

    @pl.when(k != 0)
    def _rest():
        o_ref[...] += p_sum


# ---------------------------------------------------------------------------
# Host-side API
# ---------------------------------------------------------------------------

def prepare_expert_gelu_params(w1, b1, w2, b2, *, lane_multiple=None):
    """Pad / layout the expert weights once (outside the per-call forward path).

    w1: (emb_dim, hidden)   b1: (hidden,)
    w2: (hidden, emb_dim)   b2: (emb_dim,)
    (These are the transposes of PyTorch nn.Linear's (out, in) weights.)
    """
    if lane_multiple is None:
        lane_multiple = _hw_config()["lane"]
    D, H = w1.shape
    Dp = _round_up(D, lane_multiple)
    Hp = _round_up(H, lane_multiple)
    # Zero padding is exact: GELU(0) == 0, zero weight rows/cols contribute
    # nothing, and padded output columns are sliced off in the forward.
    w1p = jnp.pad(w1, ((0, Dp - D), (0, Hp - H)))
    b1p = jnp.pad(b1.reshape(1, H), ((0, 0), (0, Hp - H)))
    w2p = jnp.pad(w2, ((0, Hp - H), (0, Dp - D)))
    b2p = jnp.pad(b2.reshape(1, D), ((0, 0), (0, Dp - D)))
    return {"w1": w1p, "b1": b1p, "w2": w2p, "b2": b2p,
            "emb_dim": D, "hidden_dim": H}


@functools.partial(jax.jit, static_argnames=("tm", "th", "vmem_limit_bytes"))
def _expert_gelu_call(x, w1p, b1p, w2p, b2p, *, tm, th, vmem_limit_bytes):
    orig_shape = x.shape
    D = orig_shape[-1]
    Dp, Hp = w1p.shape
    x2 = x.reshape(-1, D)
    N = x2.shape[0]
    if Dp != D:
        # Only the activations are padded per call; weights were pre-padded.
        x2 = jnp.pad(x2, ((0, 0), (0, Dp - D)))

    use_acc = x.dtype != jnp.float32
    grid = (pl.cdiv(N, tm), Hp // th)
    n_token_tiles = (N + tm - 1) // tm

    act_bytes = jnp.dtype(x.dtype).itemsize
    weight_bytes = (w1p.size * w1p.dtype.itemsize + b1p.size * b1p.dtype.itemsize
                    + w2p.size * w2p.dtype.itemsize + b2p.size * b2p.dtype.itemsize)
    cost = pl.CostEstimate(
        flops=4 * N * Dp * Hp,                       # two matmuls: 2*N*D*H each
        transcendentals=N * Hp,                      # one tanh per hidden act
        bytes_accessed=(N * Dp * act_bytes           # x read
                        + N * Dp * act_bytes         # output write
                        + n_token_tiles * weight_bytes),  # weights re-streamed
    )

    in_specs = [
        pl.BlockSpec((tm, Dp), lambda i, k: (i, 0)),   # x token tile
        pl.BlockSpec((Dp, th), lambda i, k: (0, k)),   # W1 hidden tile
        pl.BlockSpec((1, th), lambda i, k: (0, k)),    # b1 hidden tile
        pl.BlockSpec((th, Dp), lambda i, k: (k, 0)),   # W2 hidden tile
        pl.BlockSpec((1, Dp), lambda i, k: (0, 0)),    # b2
    ]
    out_spec = pl.BlockSpec((tm, Dp), lambda i, k: (i, 0))

    if use_acc:
        kernel = _expert_gelu_kernel_acc
        scratch = [pltpu.VMEM((tm, Dp), jnp.float32)]
    else:
        kernel = _expert_gelu_kernel_f32
        scratch = []

    out = pl.pallas_call(
        kernel,
        out_shape=jax.ShapeDtypeStruct((N, Dp), x.dtype),
        grid_spec=pltpu.PrefetchScalarGridSpec(
            num_scalar_prefetch=0,
            grid=grid,
            in_specs=in_specs,
            out_specs=out_spec,
            scratch_shapes=scratch,
        ),
        compiler_params=pltpu.CompilerParams(
            dimension_semantics=("parallel", "arbitrary"),
            vmem_limit_bytes=int(vmem_limit_bytes),
        ),
        cost_estimate=cost,
    )(x2, w1p, b1p, w2p, b2p)

    return out[:, :D].reshape(orig_shape)


def expert_gelu(x, params, *, tm=None, th=None, vmem_limit_bytes=None):
    """Forward pass. x: (..., emb_dim). params from prepare_expert_gelu_params."""
    cfg = _hw_config()
    tm = cfg["tm"] if tm is None else tm
    th = cfg["th"] if th is None else th
    vmem_limit_bytes = cfg["vmem"] if vmem_limit_bytes is None else vmem_limit_bytes

    D = params["emb_dim"]
    assert x.shape[-1] == D, "x last dim must equal emb_dim"
    w1p = params["w1"]
    Dp, Hp = w1p.shape
    N = x.size // D

    pack = _sublane_pack(x.dtype)
    tm_eff = min(_round_up(tm, pack), _round_up(N, pack))
    # Give both TensorCores work on dual-core chips (v7x).
    if cfg["cores"] >= 2 and N > pack:
        tm_eff = min(tm_eff, _round_up(-(-N // 2), pack))

    th_eff = _pick_hidden_tile(Hp, th)

    use_acc = x.dtype != jnp.float32
    tm_eff = _fit_token_tile(
        tm_eff, th_eff, Dp,
        x_bytes=jnp.dtype(x.dtype).itemsize,
        w_bytes=jnp.dtype(w1p.dtype).itemsize,
        out_bytes=jnp.dtype(x.dtype).itemsize,
        use_acc=use_acc, limit=vmem_limit_bytes, pack=pack)

    return _expert_gelu_call(x, params["w1"], params["b1"], params["w2"],
                             params["b2"], tm=tm_eff, th=th_eff,
                             vmem_limit_bytes=int(vmem_limit_bytes))


def _reference(x, w1, b1, w2, b2):
    xf = x.astype(jnp.float32)
    h = jnp.einsum("...d,dh->...h", xf, w1.astype(jnp.float32)) + b1.astype(jnp.float32)
    g = _gelu_tanh(h)
    return jnp.einsum("...h,hd->...d", g, w2.astype(jnp.float32)) + b2.astype(jnp.float32)


def _make_params(key, emb_dim, hidden, dtype):
    k1, k2, k3, k4 = jax.random.split(key, 4)
    w1 = (jax.random.normal(k1, (emb_dim, hidden), dtype=jnp.float32) * 0.02).astype(dtype)
    b1 = (jax.random.normal(k2, (hidden,), dtype=jnp.float32) * 0.02).astype(dtype)
    b2k = jax.random.normal(k4, (emb_dim,), dtype=jnp.float32) * 0.02
    w2 = (jax.random.normal(k3, (hidden, emb_dim), dtype=jnp.float32) * 0.02).astype(dtype)
    return w1, b1, w2, b2k.astype(dtype)


if __name__ == "__main__":
    key = jax.random.PRNGKey(0)

    # --- Test 1: the module's reference config ---------------------------
    # cfg = {"emb_dim": 32}, scaling_factor = 0.5 -> hidden = int(4*32*0.5) = 64
    emb_dim, scaling_factor = 32, 0.5
    hidden = int(4 * emb_dim * scaling_factor)
    batch, seq = 2, 8
    kx, kw = jax.random.split(key)
    x = jax.random.normal(kx, (batch, seq, emb_dim), dtype=jnp.float32)
    w1, b1, w2, b2 = _make_params(kw, emb_dim, hidden, jnp.float32)

    params = prepare_expert_gelu_params(w1, b1, w2, b2)
    out = jax.block_until_ready(expert_gelu(x, params))
    ref = _reference(x, w1, b1, w2, b2)
    assert out.shape == (batch, seq, emb_dim)
    assert jnp.allclose(out, ref, atol=2e-5, rtol=2e-5), "f32 aligned mismatch"

    # --- Test 2: unaligned dims + ragged token count (masked edges) ------
    emb_dim2, scaling_factor2 = 40, 0.75
    hidden2 = int(4 * emb_dim2 * scaling_factor2)   # 120, not a 128 multiple
    kx2, kw2 = jax.random.split(jax.random.PRNGKey(1))
    x2 = jax.random.normal(kx2, (3, 5, emb_dim2), dtype=jnp.float32)   # N=15
    w1b, b1b, w2b, b2b = _make_params(kw2, emb_dim2, hidden2, jnp.float32)
    params2 = prepare_expert_gelu_params(w1b, b1b, w2b, b2b)
    out2 = jax.block_until_ready(expert_gelu(x2, params2))
    ref2 = _reference(x2, w1b, b1b, w2b, b2b)
    assert out2.shape == x2.shape
    assert jnp.allclose(out2, ref2, atol=2e-5, rtol=2e-5), "f32 unaligned mismatch"

    # --- Test 3: bf16 path (exercises the f32 accumulator kernel) --------
    xb = x.astype(jnp.bfloat16)
    w1c, b1c, w2c, b2c = (w.astype(jnp.bfloat16) for w in (w1, b1, w2, b2))
    params3 = prepare_expert_gelu_params(w1c, b1c, w2c, b2c)
    out3 = jax.block_until_ready(expert_gelu(xb, params3))
    ref3 = _reference(xb, w1c, b1c, w2c, b2c)
    assert out3.dtype == jnp.bfloat16
    assert jnp.allclose(out3.astype(jnp.float32), ref3, atol=1e-2, rtol=5e-2), \
        "bf16 mismatch"

    print("KERNEL_OK")
</pallas_src>

<mosaic_0001>
module attributes {stable_mosaic.version = 11 : i64} {
  func.func @_expert_gelu_kernel_f32(%arg0: i32, %arg1: i32, %arg2: memref<16x128xf32, #tpu.memory_space<vmem>>, %arg3: memref<128x128xf32, #tpu.memory_space<vmem>>, %arg4: memref<1x128xf32, #tpu.memory_space<vmem>>, %arg5: memref<128x128xf32, #tpu.memory_space<vmem>>, %arg6: memref<1x128xf32, #tpu.memory_space<vmem>>, %arg7: memref<16x128xf32, #tpu.memory_space<vmem>>) attributes {dimension_semantics = [#tpu.dimension_semantics<parallel>, #tpu.dimension_semantics<arbitrary>], iteration_bounds = array<i64: 1, 1>, scalar_prefetch = 0 : i64, scratch_operands = 0 : i64, tpu.core_type = #tpu.core_type<tc>, window_params = [{transform_indices = @transform_0, window_bounds = array<i64: 16, 128>}, {transform_indices = @transform_1, window_bounds = array<i64: 128, 128>}, {transform_indices = @transform_2, window_bounds = array<i64: 1, 128>}, {transform_indices = @transform_3, window_bounds = array<i64: 128, 128>}, {pipeline_mode = #tpu.pipeline_mode<synchronous>, transform_indices = @transform_4, window_bounds = array<i64: 1, 128>}, {transform_indices = @transform_5, window_bounds = array<i64: 16, 128>}]} {
    %c0 = arith.constant 0 : index
    %c0_0 = arith.constant 0 : index
    %0 = vector.load %arg2[%c0, %c0_0] : memref<16x128xf32, #tpu.memory_space<vmem>>, vector<16x128xf32>
    %c0_1 = arith.constant 0 : index
    %c0_2 = arith.constant 0 : index
    %1 = vector.load %arg3[%c0_1, %c0_2] : memref<128x128xf32, #tpu.memory_space<vmem>>, vector<128x128xf32>
    %cst = arith.constant dense<0.000000e+00> : vector<16x128xf32>
    %2 = tpu.matmul %0, %1, %cst {dimension_numbers = #tpu.dot_dimension_numbers<[1], [0], [0], [1], [0, 0, 1, 1], [], []>} : vector<16x128xf32>, vector<128x128xf32>, vector<16x128xf32> -> vector<16x128xf32>
    %c0_3 = arith.constant 0 : index
    %c0_4 = arith.constant 0 : index
    %3 = vector.load %arg4[%c0_3, %c0_4] : memref<1x128xf32, #tpu.memory_space<vmem>>, vector<1x128xf32>
    %4 = vector.broadcast %3 : vector<1x128xf32> to vector<16x128xf32>
    %5 = arith.addf %2, %4 : vector<16x128xf32>
    %6 = arith.mulf %5, %5 : vector<16x128xf32>
    %cst_5 = arith.constant 4.471500e-02 : f32
    %7 = vector.broadcast %cst_5 : f32 to vector<16x128xf32>
    %8 = arith.mulf %7, %6 : vector<16x128xf32>
    %cst_6 = arith.constant 1.000000e+00 : f32
    %9 = vector.broadcast %cst_6 : f32 to vector<16x128xf32>
    %10 = arith.addf %9, %8 : vector<16x128xf32>
    %11 = arith.mulf %5, %10 : vector<16x128xf32>
    %cst_7 = arith.constant 5.000000e-01 : f32
    %12 = vector.broadcast %cst_7 : f32 to vector<16x128xf32>
    %13 = arith.mulf %12, %5 : vector<16x128xf32>
    %cst_8 = arith.constant 0.797884583 : f32
    %14 = vector.broadcast %cst_8 : f32 to vector<16x128xf32>
    %15 = arith.mulf %14, %11 : vector<16x128xf32>
    %16 = math.tanh %15 : vector<16x128xf32>
    %cst_9 = arith.constant 1.000000e+00 : f32
    %17 = vector.broadcast %cst_9 : f32 to vector<16x128xf32>
    %18 = arith.addf %17, %16 : vector<16x128xf32>
    %19 = arith.mulf %13, %18 : vector<16x128xf32>
    %c0_10 = arith.constant 0 : index
    %c0_11 = arith.constant 0 : index
    %20 = vector.load %arg5[%c0_10, %c0_11] : memref<128x128xf32, #tpu.memory_space<vmem>>, vector<128x128xf32>
    %cst_12 = arith.constant dense<0.000000e+00> : vector<16x128xf32>
    %21 = tpu.matmul %19, %20, %cst_12 {dimension_numbers = #tpu.dot_dimension_numbers<[1], [0], [0], [1], [0, 0, 1, 1], [], []>} : vector<16x128xf32>, vector<128x128xf32>, vector<16x128xf32> -> vector<16x128xf32>
    %c0_i32 = arith.constant 0 : i32
    %22 = arith.cmpi eq, %arg1, %c0_i32 : i32
    %23 = arith.extui %22 : i1 to i32
    %c0_i32_13 = arith.constant 0 : i32
    %24 = arith.cmpi ne, %23, %c0_i32_13 : i32
    scf.if %24 {
      %c0_16 = arith.constant 0 : index
      %c0_17 = arith.constant 0 : index
      %28 = vector.load %arg6[%c0_16, %c0_17] : memref<1x128xf32, #tpu.memory_space<vmem>>, vector<1x128xf32>
      %29 = vector.broadcast %28 : vector<1x128xf32> to vector<16x128xf32>
      %30 = arith.addf %21, %29 : vector<16x128xf32>
      %c0_18 = arith.constant 0 : index
      %c0_19 = arith.constant 0 : index
      %31 = vector.load %arg7[%c0_18, %c0_19] : memref<16x128xf32, #tpu.memory_space<vmem>>, vector<16x128xf32>
      tpu.vector_store %arg7[%c0_18, %c0_19], %30 {strides = array<i32>} : memref<16x128xf32, #tpu.memory_space<vmem>>, vector<16x128xf32>,
    } else {
    }
    %c0_i32_14 = arith.constant 0 : i32
    %25 = arith.cmpi ne, %arg1, %c0_i32_14 : i32
    %26 = arith.extui %25 : i1 to i32
    %c0_i32_15 = arith.constant 0 : i32
    %27 = arith.cmpi ne, %26, %c0_i32_15 : i32
    scf.if %27 {
      %c0_16 = arith.constant 0 : index
      %c0_17 = arith.constant 0 : index
      %28 = vector.load %arg7[%c0_16, %c0_17] : memref<16x128xf32, #tpu.memory_space<vmem>>, vector<16x128xf32>
      %29 = arith.addf %28, %21 : vector<16x128xf32>
      %c0_18 = arith.constant 0 : index
      %c0_19 = arith.constant 0 : index
      %30 = vector.load %arg7[%c0_18, %c0_19] : memref<16x128xf32, #tpu.memory_space<vmem>>, vector<16x128xf32>
      tpu.vector_store %arg7[%c0_18, %c0_19], %29 {strides = array<i32>} : memref<16x128xf32, #tpu.memory_space<vmem>>, vector<16x128xf32>,
    } else {
    }
    return
  }
  func.func @transform_0(%arg0: i32, %arg1: i32) -> (i32, i32) {
    %c0_i32 = arith.constant 0 : i32
    %c0_i32_0 = arith.constant 0 : i32
    return %arg0, %c0_i32 : i32, i32
  }
  func.func @transform_1(%arg0: i32, %arg1: i32) -> (i32, i32) {
    %c0_i32 = arith.constant 0 : i32
    %c0_i32_0 = arith.constant 0 : i32
    return %c0_i32, %arg1 : i32, i32
  }
  func.func @transform_2(%arg0: i32, %arg1: i32) -> (i32, i32) {
    %c0_i32 = arith.constant 0 : i32
    %c0_i32_0 = arith.constant 0 : i32
    return %c0_i32, %arg1 : i32, i32
  }
  func.func @transform_3(%arg0: i32, %arg1: i32) -> (i32, i32) {
    %c0_i32 = arith.constant 0 : i32
    %c0_i32_0 = arith.constant 0 : i32
    return %arg1, %c0_i32 : i32, i32
  }
  func.func @transform_4(%arg0: i32, %arg1: i32) -> (i32, i32) {
    %c0_i32 = arith.constant 0 : i32
    %c0_i32_0 = arith.constant 0 : i32
    %c0_i32_1 = arith.constant 0 : i32
    return %c0_i32, %c0_i32_0 : i32, i32
  }
  func.func @transform_5(%arg0: i32, %arg1: i32) -> (i32, i32) {
    %c0_i32 = arith.constant 0 : i32
    %c0_i32_0 = arith.constant 0 : i32
    return %arg0, %c0_i32 : i32, i32
  }
}

</mosaic_0001>

<bundles_post_ra>
// kernel: _expert_gelu_call.1
= control target key start
LH: loop header
LB: loop body
LE: loop exit
PB: predicated region body
PF: predicated region fallthrough
CT: control target
= control target key end

     0   :  { %10 = vsyncpa [#allocation3], 0  ;;  %s506_s0 = inlined_call_operand.vmem [shape: f32[16,128], index: 0, kind: input, shape index: {}]   ;;  %s507_s1 = inlined_call_operand.hbm [shape: f32[128,128], index: 1, kind: input, shape index: {}]   ;;  %s508_s2 = inlined_call_operand.vmem [shape: f32[1,128], index: 2, kind: input, shape index: {}]   ;;  %s509_s3 = inlined_call_operand.hbm [shape: f32[128,128], index: 3, kind: input, shape index: {}]   ;;  %s510_s4 = inlined_call_operand.vmem [shape: f32[1,128], index: 4, kind: input, shape index: {}]   ;;  %s511_s5 = inlined_call_operand.vmem [shape: f32[16,128], index: 5, kind: output, shape index: {}]  }
   0x1   :  { %11 = vsyncpa [#allocation5], 0  ;;  %s448_s18 = smov [#allocation2]  }
   0x2   :  { %s19_s19 = sshll.u32 %s448_s18, 4  ;;  %s20_s19 = int_to_ptr.vmem [resolvable:$true] %s19_s19 }
   0x3   :  { %s412_s20 = scalar_lea.vmem %s20_s19, 2048  ;;  %p417_p1 = scmp.lt.s32.totalorder %s20_s19, %s20_s19 }
   0x4   :  { %p413_p0 = scmp.ne.s32.totalorder %s20_s19, %s412_s20  ;;  %p418_p2 = scmp.lt.s32.totalorder %s412_s20, %s412_s20 }
   0x6   :  { %p419_p3 = por %p418_p2, %p417_p1 }
   0x8   :  { %p420_p4 = pnand %p419_p3, %p413_p0 }
   0xa   :  { %423 = shalt.err (!%p420_p4)
}
   0xb   :  { %s449_s21 = smov 128   ;;  %s450_s22 = smov 8  }
   0xc   :  { %25 = dma.hbm_to_vmem [thread:$0]  %s507_s1, 2048, %s20_s19, [#allocation3], %s449_s21, %s449_s21, %s450_s22  }
   0xd   :  { %s451_s25 = smov [#allocation4]  }
   0xe   :  { %s33_s26 = sshll.u32 %s451_s25, 4  ;;  %s34_s26 = int_to_ptr.vmem [resolvable:$true] %s33_s26 }
   0xf   :  { %s432_s27 = scalar_lea.vmem %s34_s26, 2048  ;;  %p437_p6 = scmp.lt.s32.totalorder %s34_s26, %s34_s26 }
  0x10   :  { %p433_p5 = scmp.ne.s32.totalorder %s34_s26, %s432_s27  ;;  %p438_p7 = scmp.lt.s32.totalorder %s432_s27, %s432_s27 }
  0x12   :  { %p439_p8 = por %p438_p7, %p437_p6 }
  0x14   :  { %p440_p9 = pnand %p439_p8, %p433_p5 }
  0x16   :  { %443 = shalt.err (!%p440_p9)
}
  0x17   :  { %39 = dma.hbm_to_vmem [thread:$0]  %s509_s3, 2048, %s34_s26, [#allocation5], %s449_s21, %s449_s21, %s450_s22  }
  0x18   :  { %444 = dma.done.wait [#allocation3], 2048  }
  0x19   :  { %445 = vsyncadd [#allocation3], 4294965248 }
  0x1a   :  { %446 = dma.done.wait [#allocation5], 2048  }
  0x1b   :  { %447 = vsyncadd [#allocation5], 4294965248  ;;  %v65_v0 = vld [vmem:[#allocation2 + $0x78] sm:$0xff]  ;;  %v64_v1 = vld [vmem:[#allocation2 + $0x70] sm:$0xff] }
  0x1c   :  { %326 = vmatprep.subr.mxu0 %v65_v0  ;;  %v63_v2 = vld [vmem:[#allocation2 + $0x68] sm:$0xff]  ;;  %v62_v3 = vld [vmem:[#allocation2 + $0x60] sm:$0xff]  ;;  %v61_v5 = vld [vmem:[#allocation2 + $0x58] sm:$0xff] }
  0x1d   :  { %327 = vmatpush3.msra.mxu0 %v65_v0  ;;  %v48_v4 = vld [vmem:[%s506_s0] sm:$0xff]  ;;  %v60_v6 = vld [vmem:[#allocation2 + $0x50] sm:$0xff]  ;;  %v59_v7 = vld [vmem:[#allocation2 + $0x48] sm:$0xff] }
  0x1e   :  { %328 = vmatprep.subr.mxu0 %v64_v1  ;;  %358 = vmatprep.mubr.f32.mxu0 %v48_v4  ;;  %v58_v8 = vld [vmem:[#allocation2 + $0x40] sm:$0xff]  ;;  %v57_v9 = vld [vmem:[#allocation2 + $0x38] sm:$0xff]  ;;  %v56_v10 = vld [vmem:[#allocation2 + $0x30] sm:$0xff] }
  0x1f   :  { %329 = vmatpush3.msra.mxu0 %v64_v1  ;;  %v55_v11 = vld [vmem:[#allocation2 + $0x28] sm:$0xff]  ;;  %v54_v12 = vld [vmem:[#allocation2 + $0x20] sm:$0xff]  ;;  %v53_v13 = vld [vmem:[#allocation2 + $0x18] sm:$0xff] }
  0x20   :  { %330 = vmatprep.subr.mxu0 %v63_v2  ;;  %v52_v14 = vld [vmem:[#allocation2 + $0x10] sm:$0xff]  ;;  %v51_v15 = vld [vmem:[#allocation2 + $0x8] sm:$0xff]  ;;  %v50_v16 = vld [vmem:[#allocation2] sm:$0xff] }
  0x21   :  { %331 = vmatpush3.msra.mxu0 %v63_v2  ;;  %v49_v17 = vld [vmem:[%s506_s0 + $0x8] sm:$0xff]  ;;  %v181_v18 = vld [vmem:[#allocation4 + $0x78] sm:$0xff]  ;;  %v180_v19 = vld [vmem:[#allocation4 + $0x70] sm:$0xff] }
  0x22   :  { %332 = vmatprep.subr.mxu0 %v62_v3  ;;  %361 = vmatprep.subr.mxu1 %v181_v18  ;;  %v179_v20 = vld [vmem:[#allocation4 + $0x68] sm:$0xff]  ;;  %v178_v21 = vld [vmem:[#allocation4 + $0x60] sm:$0xff]  ;;  %v177_v22 = vld [vmem:[#allocation4 + $0x58] sm:$0xff] }
  0x23   :  { %333 = vmatpush3.msra.mxu0 %v62_v3  ;;  %362 = vmatpush3.msra.mxu1 %v181_v18  ;;  %v176_v23 = vld [vmem:[#allocation4 + $0x50] sm:$0xff]  ;;  %v175_v24 = vld [vmem:[#allocation4 + $0x48] sm:$0xff]  ;;  %v174_v25 = vld [vmem:[#allocation4 + $0x40] sm:$0xff] }
  0x24   :  { %334 = vmatprep.subr.mxu0 %v61_v5  ;;  %363 = vmatprep.subr.mxu1 %v180_v19  ;;  %v173_v26 = vld [vmem:[#allocation4 + $0x38] sm:$0xff]  ;;  %v172_v27 = vld [vmem:[#allocation4 + $0x30] sm:$0xff]  ;;  %v171_v28 = vld [vmem:[#allocation4 + $0x28] sm:$0xff] }
  0x25   :  { %335 = vmatpush3.msra.mxu0 %v61_v5  ;;  %364 = vmatpush3.msra.mxu1 %v180_v19  ;;  %v170_v29 = vld [vmem:[#allocation4 + $0x20] sm:$0xff]  ;;  %v169_v30 = vld [vmem:[#allocation4 + $0x18] sm:$0xff]  ;;  %v168_v31 = vld [vmem:[#allocation4 + $0x10] sm:$0xff] }
  0x26   :  { %336 = vmatprep.subr.mxu0 %v60_v6  ;;  %365 = vmatprep.subr.mxu1 %v179_v20  ;;  %v167_v32 = vld [vmem:[#allocation4 + $0x8] sm:$0xff]  ;;  %v166_v33 = vld [vmem:[#allocation4] sm:$0xff] }
  0x27   :  { %337 = vmatpush3.msra.mxu0 %v60_v6  ;;  %366 = vmatpush3.msra.mxu1 %v179_v20  ;;  %v288_v34 = vld [vmem:[%s508_s2] ss:$0 sm:$0xff] }
  0x28   :  { %338 = vmatprep.subr.mxu0 %v59_v7  ;;  %367 = vmatprep.subr.mxu1 %v178_v21  ;;  %v289_v57 = vld [vmem:[%s510_s4] ss:$0 sm:$0xff] }
  0x29   :  { %339 = vmatpush3.msra.mxu0 %v59_v7  ;;  %368 = vmatpush3.msra.mxu1 %v178_v21 }
  0x2a   :  { %340 = vmatprep.subr.mxu0 %v58_v8  ;;  %369 = vmatprep.subr.mxu1 %v177_v22 }
  0x2b   :  { %341 = vmatpush3.msra.mxu0 %v58_v8  ;;  %370 = vmatpush3.msra.mxu1 %v177_v22 }
  0x2c   :  { %342 = vmatprep.subr.mxu0 %v57_v9  ;;  %371 = vmatprep.subr.mxu1 %v176_v23 }
  0x2d   :  { %343 = vmatpush3.msra.mxu0 %v57_v9  ;;  %372 = vmatpush3.msra.mxu1 %v176_v23 }
  0x2e   :  { %344 = vmatprep.subr.mxu0 %v56_v10  ;;  %373 = vmatprep.subr.mxu1 %v175_v24 }
  0x2f   :  { %345 = vmatpush3.msra.mxu0 %v56_v10  ;;  %374 = vmatpush3.msra.mxu1 %v175_v24 }
  0x30   :  { %346 = vmatprep.subr.mxu0 %v55_v11  ;;  %375 = vmatprep.subr.mxu1 %v174_v25 }
  0x31   :  { %347 = vmatpush3.msra.mxu0 %v55_v11  ;;  %376 = vmatpush3.msra.mxu1 %v174_v25 }
  0x32   :  { %348 = vmatprep.subr.mxu0 %v54_v12  ;;  %377 = vmatprep.subr.mxu1 %v173_v26 }
  0x33   :  { %349 = vmatpush3.msra.mxu0 %v54_v12  ;;  %378 = vmatpush3.msra.mxu1 %v173_v26 }
  0x34   :  { %350 = vmatprep.subr.mxu0 %v53_v13  ;;  %379 = vmatprep.subr.mxu1 %v172_v27 }
  0x35   :  { %351 = vmatpush3.msra.mxu0 %v53_v13  ;;  %380 = vmatpush3.msra.mxu1 %v172_v27 }
  0x36   :  { %352 = vmatprep.subr.mxu0 %v52_v14  ;;  %381 = vmatprep.subr.mxu1 %v171_v28 }
  0x37   :  { %353 = vmatpush3.msra.mxu0 %v52_v14  ;;  %382 = vmatpush3.msra.mxu1 %v171_v28 }
  0x38   :  { %354 = vmatprep.subr.mxu0 %v51_v15  ;;  %383 = vmatprep.subr.mxu1 %v170_v29 }
  0x39   :  { %355 = vmatpush3.msra.mxu0 %v51_v15  ;;  %384 = vmatpush3.msra.mxu1 %v170_v29 }
  0x3a   :  { %356 = vmatprep.subr.mxu0 %v50_v16  ;;  %385 = vmatprep.subr.mxu1 %v169_v30 }
  0x3b   :  { %357 = vmatpush3.msra.mxu0 %v50_v16  ;;  %386 = vmatpush3.msra.mxu1 %v169_v30 }
  0x3c   :  { %359 = vmatmul.mubr.f32.vlgmr.msra.gmra.mxu0 %v49_v17  ;;  %387 = vmatprep.subr.mxu1 %v168_v31 }
  0x3d   :  { %388 = vmatpush3.msra.mxu1 %v168_v31 }
  0x3e   :  { %389 = vmatprep.subr.mxu1 %v167_v32 }
  0x3f   :  { %390 = vmatpush3.msra.mxu1 %v167_v32 }
  0x40   :  { %391 = vmatprep.subr.mxu1 %v166_v33 }
  0x41   :  { %392 = vmatpush3.msra.mxu1 %v166_v33 }
  0xfc   :  { %v360_v35 = vpop.f32.mrf.mxu0 }
  0xfd   :  { %v145_v36 = vadd.f32 %v360_v35, %v288_v34 }
  0xfe   :  { %v139_v37 = vpop.f32.mrf.mxu0 }
  0xff   :  { %v149_v38 = vmul.f32 %v145_v36, %v145_v36  ;;  %v140_v39 = vadd.f32 %v288_v34, %v139_v37  ;;  %v157_v54 = vmul.f32 0.5, %v145_v36 }
 0x101   :  { %v151_v40 = vmul.f32 0.044715, %v149_v38  ;;  %v148_v41 = vmul.f32 %v140_v39, %v140_v39  ;;  %v156_v52 = vmul.f32 0.5, %v140_v39 }
 0x103   :  { %v153_v42 = vadd.f32 1.0, %v151_v40  ;;  %v150_v43 = vmul.f32 0.044715, %v148_v41 }
 0x105   :  { %v155_v44 = vmul.f32 %v153_v42, %v145_v36  ;;  %v152_v45 = vadd.f32 1.0, %v150_v43 }
 0x107   :  { %v159_v46 = vmul.f32 0.7978846, %v155_v44  ;;  %v154_v47 = vmul.f32 %v152_v45, %v140_v39 }
 0x109   :  { %400 = vtanh.f32 %v159_v46  ;;  %v158_v48 = vmul.f32 0.7978846, %v154_v47 }
 0x10b   :  { %402 = vtanh.f32 %v158_v48 }
 0x116   :  { %v401_v49 = vpop.eup %400 }
 0x117   :  { %v163_v51 = vadd.f32 1.0, %v401_v49 }
 0x118   :  { %v403_v50 = vpop.eup %402 }
 0x119   :  { %v162_v53 = vadd.f32 1.0, %v403_v50  ;;  %v165_v56 = vmul.f32 %v163_v51, %v157_v54 }
 0x11b   :  { %v164_v55 = vmul.f32 %v162_v53, %v156_v52 }
 0x11d   :  { %393 = vmatprep.mubr.f32.mxu1 %v164_v55 }
 0x11e   :  { %394 = vmatmul.mubr.f32.vlgmr.msra.gmra.mxu1 %v165_v56 }
 0x1de   :  { %v395_v58 = vpop.f32.mrf.mxu1 }
 0x1df   :  { %v269_v59 = vadd.f32 %v395_v58, %v289_v57 }
 0x1e0   :  { %v248_v60 = vpop.f32.mrf.mxu1 }
 0x1e1   :  { %271 = vst [vmem:[%s511_s5 + $0x8] sm:$0xff] %v269_v59  ;;  %v268_v61 = vadd.f32 %v289_v57, %v248_v60 }
 0x1e3   :  { %270 = vst [vmem:[%s511_s5] sm:$0xff] %v268_v61 }
 0x1e4   :  { %286 = vsyncpa [#allocation3], 1 }
 0x1e5   :  { %287 = vsyncpa [#allocation5], 1 }

</bundles_post_ra>
